<compile_context>
chip_gen: v7x
topology: tpu7x:2x2x1
jax: 0.10.0
libtpu: 0.0.40
codegen_flags: <defaults>
</compile_context>

<pallas_src>
import functools

import jax
import jax.numpy as jnp
from jax import lax
from jax.experimental import pallas as pl
from jax.experimental.pallas import tpu as pltpu

LOG_STD_MIN = -20.0
LOG_STD_MAX = 2.0
LANES = 128  # lane-dense slab width for the fused head output / packed params


def _round_up(x, m):
    return (x + m - 1) // m * m


def _policy_kernel(x_ref, w_ref, b_ref, out_ref, *, S, H, A):
    """One batch tile of the fused policy MLP.

    x_ref   : [TB, S]        f32   state tile (pipelined over the batch grid)
    w_ref   : [S + 2H, 128]  bf16  packed weights: rows [0:S]=W1, [S:S+H]=W2,
                                   [S+H:S+2H]=[Wm | Ws | 0-pad]
    b_ref   : [3, 128]       f32   packed biases: row0=b1, row1=b2, row2=[bm|bs|0]
    out_ref : [TB, 128]      f32   lane-dense slab: [:, :A]=mean,
                                   [:, A:2A]=clamped log_std, rest is zero pad
    """
    x = x_ref[...]

    w1 = w_ref[0:S, 0:H]                  # bf16 [S, H]
    w2 = w_ref[S:S + H, 0:H]              # bf16 [H, H]
    wh = w_ref[S + H:S + 2 * H, :]        # bf16 [H, 128]  (fused heads)
    b1 = b_ref[0:1, 0:H]
    b2 = b_ref[1:2, 0:H]
    bh = b_ref[2:3, :]

    # fc1 + relu  (bf16 MXU matmul, f32 accumulate / bias / relu)
    h1 = jnp.dot(x.astype(jnp.bfloat16), w1,
                 preferred_element_type=jnp.float32) + b1
    h1 = jnp.maximum(h1, 0.0)

    # fc2 + relu
    h2 = jnp.dot(h1.astype(jnp.bfloat16), w2,
                 preferred_element_type=jnp.float32) + b2
    h2 = jnp.maximum(h2, 0.0)

    # fused mean / log_std heads -> one lane-dense [TB, 128] slab
    y = jnp.dot(h2.astype(jnp.bfloat16), wh,
                preferred_element_type=jnp.float32) + bh

    # clamp only the log_std lanes (columns A .. 2A-1); mean lanes untouched
    col = lax.broadcasted_iota(jnp.int32, y.shape, 1)
    is_log_std = (col >= A) & (col < 2 * A)
    y = jnp.where(is_log_std, jnp.clip(y, LOG_STD_MIN, LOG_STD_MAX), y)

    out_ref[...] = y.astype(out_ref.dtype)


def policy_forward(state, params, *, block_rows=512):
    """state: [B, S] f32 -> (mean [B, A], log_std [B, A]).

    Matmuls run in bf16 with f32 accumulation (MXU-native); everything else f32.
    """
    w1, b1, w2, b2, wm, bm, ws, bs = params
    B, S = state.shape
    H = w1.shape[1]
    A = wm.shape[1]
    P = LANES
    assert 2 * A <= P, "action_size too large for a single 128-lane head slab"

    # ---- parameter packing (layout plumbing, outside the kernel) -----------
    def pad_cols(a):
        return jnp.pad(a, ((0, 0), (0, P - a.shape[1])))

    w_heads = pad_cols(jnp.concatenate([wm, ws], axis=1))        # [H, 128]
    b_heads = pad_cols(jnp.concatenate([bm, bs], axis=1))        # [1, 128]
    w_slab = jnp.concatenate([pad_cols(w1), pad_cols(w2), w_heads],
                             axis=0).astype(jnp.bfloat16)        # [S+2H, 128]
    b_slab = jnp.concatenate([pad_cols(b1), pad_cols(b2), b_heads],
                             axis=0).astype(jnp.float32)         # [3, 128]

    # ---- batch tiling -------------------------------------------------------
    TB = min(block_rows, max(8, _round_up(B, 8)))   # row tile, multiple of 8
    Bp = _round_up(B, TB)                           # padded batch
    if Bp != B:
        state = jnp.pad(state, ((0, Bp - B), (0, 0)))

    kernel = functools.partial(_policy_kernel, S=S, H=H, A=A)
    out = pl.pallas_call(
        kernel,
        out_shape=jax.ShapeDtypeStruct((Bp, P), jnp.float32),
        grid=(pl.cdiv(Bp, TB),),
        in_specs=[
            pl.BlockSpec((TB, S), lambda i: (i, 0)),          # state: pipelined
            pl.BlockSpec((S + 2 * H, P), lambda i: (0, 0)),   # weights: resident
            pl.BlockSpec((3, P), lambda i: (0, 0)),           # biases: resident
        ],
        out_specs=pl.BlockSpec((TB, P), lambda i: (i, 0)),
        compiler_params=pltpu.CompilerParams(
            dimension_semantics=("parallel",),     # shard batch axis on v7x's 2 TCs
            vmem_limit_bytes=32 * 1024 * 1024,     # safe on every generation
        ),
    )(state, w_slab, b_slab)

    mean = out[:B, :A]
    log_std = out[:B, A:2 * A]
    return mean, log_std


def init_params(key, state_size, hidden_size, action_size, init_w=0.003):
    """Deterministic init mirroring the PyTorch module's shapes / init style."""
    k1, k2, k3, k4, k5, k6 = jax.random.split(key, 6)

    def linear_default(kw, kb, fan_in, fan_out):
        bound = 1.0 / jnp.sqrt(fan_in)
        w = jax.random.uniform(kw, (fan_in, fan_out), jnp.float32, -bound, bound)
        b = jax.random.uniform(kb, (1, fan_out), jnp.float32, -bound, bound)
        return w, b

    w1, b1 = linear_default(k1, k2, state_size, hidden_size)
    w2, b2 = linear_default(k3, k4, hidden_size, hidden_size)

    km1, km2 = jax.random.split(k5)
    ks1, ks2 = jax.random.split(k6)
    wm = jax.random.uniform(km1, (hidden_size, action_size), jnp.float32, -init_w, init_w)
    bm = jax.random.uniform(km2, (1, action_size), jnp.float32, -init_w, init_w)
    ws = jax.random.uniform(ks1, (hidden_size, action_size), jnp.float32, -init_w, init_w)
    bs = jax.random.uniform(ks2, (1, action_size), jnp.float32, -init_w, init_w)

    return (w1, b1, w2, b2, wm, bm, ws, bs)


def reference_forward_bf16(state, params):
    """Pure-JAX reference with the same bf16-matmul / f32-accumulate math."""
    w1, b1, w2, b2, wm, bm, ws, bs = params

    def dot(a, w):
        return jnp.dot(a.astype(jnp.bfloat16), w.astype(jnp.bfloat16),
                       preferred_element_type=jnp.float32)

    h1 = jnp.maximum(dot(state, w1) + b1, 0.0)
    h2 = jnp.maximum(dot(h1, w2) + b2, 0.0)
    mean = dot(h2, wm) + bm
    log_std = jnp.clip(dot(h2, ws) + bs, LOG_STD_MIN, LOG_STD_MAX)
    return mean, log_std


def reference_forward_f32(state, params):
    """Exact f32 math of the original PyTorch module."""
    w1, b1, w2, b2, wm, bm, ws, bs = params
    h1 = jnp.maximum(state @ w1 + b1, 0.0)
    h2 = jnp.maximum(h1 @ w2 + b2, 0.0)
    mean = h2 @ wm + bm
    log_std = jnp.clip(h2 @ ws + bs, LOG_STD_MIN, LOG_STD_MAX)
    return mean, log_std


if __name__ == "__main__":
    batch = 2
    state_size = 16
    hidden_size = 32
    action_size = 8

    key = jax.random.PRNGKey(0)
    kx, kp = jax.random.split(key)

    state = jax.random.normal(kx, (batch, state_size), jnp.float32)
    params = init_params(kp, state_size, hidden_size, action_size)

    mean, log_std = policy_forward(state, params)
    jax.block_until_ready((mean, log_std))

    # Tight check against a reference using the same bf16/f32 matmul math.
    mean_ref, log_std_ref = reference_forward_bf16(state, params)
    assert mean.shape == (batch, action_size) and log_std.shape == (batch, action_size)
    assert jnp.allclose(mean, mean_ref, atol=1e-4, rtol=1e-3)
    assert jnp.allclose(log_std, log_std_ref, atol=1e-4, rtol=1e-3)

    # Loose check against the exact f32 semantics of the PyTorch module.
    mean_f32, log_std_f32 = reference_forward_f32(state, params)
    assert jnp.allclose(mean, mean_f32, atol=5e-3)
    assert jnp.allclose(log_std, log_std_f32, atol=5e-3)

    # TODO(synk): evaluate()/get_action() (Normal sampling, tanh/sigmoid squash,
    # log_prob) are rollout-time policy logic outside forward(); not kernelized.

    print("KERNEL_OK")
</pallas_src>

<mosaic_0001>
module attributes {stable_mosaic.version = 11 : i64} {
  func.func @_policy_kernel(%arg0: i32, %arg1: memref<8x16xf32, #tpu.memory_space<vmem>>, %arg2: memref<80x128xbf16, #tpu.memory_space<vmem>>, %arg3: memref<3x128xf32, #tpu.memory_space<vmem>>, %arg4: memref<8x128xf32, #tpu.memory_space<vmem>>) attributes {dimension_semantics = [#tpu.dimension_semantics<parallel>], iteration_bounds = array<i64: 1>, scalar_prefetch = 0 : i64, scratch_operands = 0 : i64, tpu.core_type = #tpu.core_type<tc>, window_params = [{transform_indices = @transform_0, window_bounds = array<i64: 8, 16>}, {pipeline_mode = #tpu.pipeline_mode<synchronous>, transform_indices = @transform_1, window_bounds = array<i64: 80, 128>}, {pipeline_mode = #tpu.pipeline_mode<synchronous>, transform_indices = @transform_2, window_bounds = array<i64: 3, 128>}, {transform_indices = @transform_3, window_bounds = array<i64: 8, 128>}]} {
    %c0 = arith.constant 0 : index
    %c0_0 = arith.constant 0 : index
    %0 = vector.load %arg1[%c0, %c0_0] : memref<8x16xf32, #tpu.memory_space<vmem>>, vector<8x16xf32>
    %c0_1 = arith.constant 0 : index
    %c0_2 = arith.constant 0 : index
    %1 = vector.load %arg2[%c0_1, %c0_2] : memref<80x128xbf16, #tpu.memory_space<vmem>>, vector<16x32xbf16>
    %c16 = arith.constant 16 : index
    %c0_3 = arith.constant 0 : index
    %2 = vector.load %arg2[%c16, %c0_3] : memref<80x128xbf16, #tpu.memory_space<vmem>>, vector<32x32xbf16>
    %c48 = arith.constant 48 : index
    %c0_4 = arith.constant 0 : index
    %3 = vector.load %arg2[%c48, %c0_4] : memref<80x128xbf16, #tpu.memory_space<vmem>>, vector<32x128xbf16>
    %c0_5 = arith.constant 0 : index
    %c0_6 = arith.constant 0 : index
    %4 = vector.load %arg3[%c0_5, %c0_6] : memref<3x128xf32, #tpu.memory_space<vmem>>, vector<1x32xf32>
    %c1 = arith.constant 1 : index
    %c0_7 = arith.constant 0 : index
    %5 = vector.load %arg3[%c1, %c0_7] : memref<3x128xf32, #tpu.memory_space<vmem>>, vector<1x32xf32>
    %c2 = arith.constant 2 : index
    %c0_8 = arith.constant 0 : index
    %6 = vector.load %arg3[%c2, %c0_8] : memref<3x128xf32, #tpu.memory_space<vmem>>, vector<1x128xf32>
    %7 = arith.truncf %0 : vector<8x16xf32> to vector<8x16xbf16>
    %cst = arith.constant dense<0.000000e+00> : vector<8x32xf32>
    %8 = tpu.matmul %7, %1, %cst {dimension_numbers = #tpu.dot_dimension_numbers<[1], [0], [0], [1], [0, 0, 1, 1], [], []>} : vector<8x16xbf16>, vector<16x32xbf16>, vector<8x32xf32> -> vector<8x32xf32>
    %9 = vector.broadcast %4 : vector<1x32xf32> to vector<8x32xf32>
    %10 = arith.addf %8, %9 : vector<8x32xf32>
    %cst_9 = arith.constant 0.000000e+00 : f32
    %11 = vector.broadcast %cst_9 : f32 to vector<8x32xf32>
    %12 = arith.maximumf %10, %11 : vector<8x32xf32>
    %13 = arith.truncf %12 : vector<8x32xf32> to vector<8x32xbf16>
    %cst_10 = arith.constant dense<0.000000e+00> : vector<8x32xf32>
    %14 = tpu.matmul %13, %2, %cst_10 {dimension_numbers = #tpu.dot_dimension_numbers<[1], [0], [0], [1], [0, 0, 1, 1], [], []>} : vector<8x32xbf16>, vector<32x32xbf16>, vector<8x32xf32> -> vector<8x32xf32>
    %15 = vector.broadcast %5 : vector<1x32xf32> to vector<8x32xf32>
    %16 = arith.addf %14, %15 : vector<8x32xf32>
    %cst_11 = arith.constant 0.000000e+00 : f32
    %17 = vector.broadcast %cst_11 : f32 to vector<8x32xf32>
    %18 = arith.maximumf %16, %17 : vector<8x32xf32>
    %19 = arith.truncf %18 : vector<8x32xf32> to vector<8x32xbf16>
    %cst_12 = arith.constant dense<0.000000e+00> : vector<8x128xf32>
    %20 = tpu.matmul %19, %3, %cst_12 {dimension_numbers = #tpu.dot_dimension_numbers<[1], [0], [0], [1], [0, 0, 1, 1], [], []>} : vector<8x32xbf16>, vector<32x128xbf16>, vector<8x128xf32> -> vector<8x128xf32>
    %21 = vector.broadcast %6 : vector<1x128xf32> to vector<8x128xf32>
    %22 = arith.addf %20, %21 : vector<8x128xf32>
    %23 = tpu.iota {dimensions = array<i32: 1>} : vector<8x128xi32>
    %c8_i32 = arith.constant 8 : i32
    %24 = vector.broadcast %c8_i32 : i32 to vector<8x128xi32>
    %25 = arith.cmpi sge, %23, %24 : vector<8x128xi32>
    %c16_i32 = arith.constant 16 : i32
    %26 = vector.broadcast %c16_i32 : i32 to vector<8x128xi32>
    %27 = arith.cmpi slt, %23, %26 : vector<8x128xi32>
    %28 = arith.andi %25, %27 : vector<8x128xi1>
    %cst_13 = arith.constant -2.000000e+01 : f32
    %cst_14 = arith.constant 2.000000e+00 : f32
    %29 = vector.broadcast %cst_13 : f32 to vector<8x128xf32>
    %30 = arith.maximumf %29, %22 : vector<8x128xf32>
    %31 = vector.broadcast %cst_14 : f32 to vector<8x128xf32>
    %32 = arith.minimumf %31, %30 : vector<8x128xf32>
    %33 = arith.select %28, %32, %22 : vector<8x128xi1>, vector<8x128xf32>
    %c0_15 = arith.constant 0 : index
    %c0_16 = arith.constant 0 : index
    %34 = vector.load %arg4[%c0_15, %c0_16] : memref<8x128xf32, #tpu.memory_space<vmem>>, vector<8x128xf32>
    tpu.vector_store %arg4[%c0_15, %c0_16], %33 {strides = array<i32>} : memref<8x128xf32, #tpu.memory_space<vmem>>, vector<8x128xf32>,
    return
  }
  func.func @transform_0(%arg0: i32) -> (i32, i32) {
    %c0_i32 = arith.constant 0 : i32
    %c0_i32_0 = arith.constant 0 : i32
    return %arg0, %c0_i32 : i32, i32
  }
  func.func @transform_1(%arg0: i32) -> (i32, i32) {
    %c0_i32 = arith.constant 0 : i32
    %c0_i32_0 = arith.constant 0 : i32
    %c0_i32_1 = arith.constant 0 : i32
    return %c0_i32, %c0_i32_0 : i32, i32
  }
  func.func @transform_2(%arg0: i32) -> (i32, i32) {
    %c0_i32 = arith.constant 0 : i32
    %c0_i32_0 = arith.constant 0 : i32
    %c0_i32_1 = arith.constant 0 : i32
    return %c0_i32, %c0_i32_0 : i32, i32
  }
  func.func @transform_3(%arg0: i32) -> (i32, i32) {
    %c0_i32 = arith.constant 0 : i32
    %c0_i32_0 = arith.constant 0 : i32
    return %arg0, %c0_i32 : i32, i32
  }
}

</mosaic_0001>

<bundles_post_ra>
// kernel: tpu_custom_call.1
= control target key start
LH: loop header
LB: loop body
LE: loop exit
PB: predicated region body
PF: predicated region fallthrough
CT: control target
= control target key end

     0   :  { %8 = vsyncpa [#allocation3], 0  ;;  %s463_s0 = inlined_call_operand.hbm [shape: f32[8,16], index: 0, kind: input, shape index: {}]   ;;  %s464_s1 = inlined_call_operand.hbm [shape: bf16[80,128], index: 1, kind: input, shape index: {}]   ;;  %s465_s2 = inlined_call_operand.vmem [shape: f32[3,128], index: 2, kind: input, shape index: {}]   ;;  %s466_s3 = inlined_call_operand.hbm [shape: f32[8,128], index: 3, kind: output, shape index: {}]  }
   0x1   :  { %9 = vsyncpa [#allocation6], 0 }
   0x2   :  { %10 = vsyncpa [#allocation4], 0  ;;  %s384_s12 = smov [#allocation2]   ;;  %s385_s14 = smov [#allocation5]  }
   0x3   :  { %s17_s13 = sshll.u32 %s384_s12, 4  ;;  %s26_s15 = sshll.u32 %s385_s14, 4  ;;  %s18_s13 = int_to_ptr.vmem [resolvable:$true] %s17_s13  ;;  %s411_s15 = int_to_ptr.vmem [resolvable:$true] %s26_s15 }
   0x4   :  { %s312_s18 = scalar_lea.hbm %s463_s0, 128 }
   0x5   :  { %p313_p0 = scmp.ne.s32.totalorder %s463_s0, %s312_s18  ;;  %p316_p1 = scmp.lt.u32.totalorder %s312_s18, %s463_s0 }
   0x7   :  { %p318_p2 = pnand %p316_p1, %p313_p0 }
   0x9   :  { %321 = shalt.err (!%p318_p2)
}
   0xa   :  { %s322_s23 = scalar_lea.vmem %s18_s13, 128  ;;  %p327_p4 = scmp.lt.s32.totalorder %s18_s13, %s18_s13 }
   0xb   :  { %p323_p3 = scmp.ne.s32.totalorder %s18_s13, %s322_s23  ;;  %p328_p5 = scmp.lt.s32.totalorder %s322_s23, %s322_s23 }
   0xd   :  { %p329_p6 = por %p328_p5, %p327_p4 }
   0xf   :  { %p330_p7 = pnand %p329_p6, %p323_p3 }
  0x11   :  { %333 = shalt.err (!%p330_p7)
}
  0x12   :  { %20 = dma.hbm_to_vmem [thread:$0]  %s463_s0, 128, %s18_s13, [#allocation3]  }
  0x13   :  { %s334_s28 = scalar_lea.hbm %s464_s1, 640 }
  0x14   :  { %p335_p8 = scmp.ne.s32.totalorder %s464_s1, %s334_s28  ;;  %p338_p9 = scmp.lt.u32.totalorder %s334_s28, %s464_s1 }
  0x16   :  { %p340_p10 = pnand %p338_p9, %p335_p8 }
  0x18   :  { %343 = shalt.err (!%p340_p10)
}
  0x19   :  { %s344_s6 = scalar_lea.vmem %s411_s15, 640  ;;  %p349_p12 = scmp.lt.s32.totalorder %s411_s15, %s411_s15 }
  0x1a   :  { %p345_p11 = scmp.ne.s32.totalorder %s411_s15, %s344_s6  ;;  %p350_p13 = scmp.lt.s32.totalorder %s344_s6, %s344_s6 }
  0x1c   :  { %p351_p0 = por %p350_p13, %p349_p12 }
  0x1e   :  { %p352_p1 = pnand %p351_p0, %p345_p11 }
  0x20   :  { %355 = shalt.err (!%p352_p1)
}
  0x21   :  { %s386_s0 = smov 64   ;;  %s387_s7 = smov 4  }
  0x22   :  { %32 = dma.hbm_to_vmem [thread:$0]  %s464_s1, 640, %s411_s15, [#allocation6], %s386_s0, %s386_s0, %s387_s7  }
  0x23   :  { %378 = dma.done.wait [#allocation3], 128  }
  0x24   :  { %379 = vsyncadd [#allocation3], 4294967168 }
  0x25   :  { %380 = dma.done.wait [#allocation6], 640  }
  0x26   :  { %381 = vsyncadd [#allocation6], 4294966656  ;;  %v388_v0 = vmov 0.0   ;;  %vm389_vm0 = vmmov 0   ;;  %v307_v1 = vld [vmem:[#allocation5] sm:$0xff]   ;;  %v42_v2 = vld [vmem:[#allocation2] sm:$0xff]  ;;  %v234_v24 = vlaneseq }
  0x27   :  { %278 = vmatprep.subr.bf16.mxu0 %v388_v0  ;;  %280 = vmatprep.mubr.msk.bf16.mxu0 %vm389_vm0, %v388_v0  ;;  %vm67_vm1 = vcmask 130048   ;;  %v56_v3 = vpack.c.bf16 %v42_v2, %v42_v2  ;;  %v308_v4 = vld [vmem:[#allocation5 + $0x8] sm:$0xff]   ;;  %v309_v5 = vld [vmem:[#allocation5 + $0x10] sm:$0xff]   ;;  %v310_v6 = vld [vmem:[#allocation5 + $0x18] sm:$0xff]   ;;  %vm129_vm2 = vcmask 261120   ;;  %s390_s15 = smov [#allocation7]  }
  0x28   :  { %284 = vmatprep.subr.bf16.mxu1 %v388_v0  ;;  %288 = vmatprep.mubr.msk.bf16.mxu1 %vm389_vm0, %v388_v0  ;;  %v259_v7 = vld [vmem:[%s465_s2] ss:$0 sm:$0xff]  ;;  %v311_v15 = vld [vmem:[#allocation5 + $0x20] sm:$0xff]   ;;  %v262_v16 = vld [vmem:[%s465_s2 + $0x1] ss:$0 sm:$0xff]  ;;  %v235_v25 = vand.u32 127, %v234_v24 }
  0x29   :  { %279 = vmatpush3.bf16.msra.mxu0 %v307_v1  ;;  %285 = vmatpush3.bf16.msra.mxu1 %v308_v4  ;;  %v266_v26 = vld [vmem:[%s465_s2 + $0x2] ss:$0 sm:$0xff]  ;;  %s249_s16 = sshll.u32 %s390_s15, 4  ;;  %s250_s16 = int_to_ptr.vmem [resolvable:$true] %s249_s16 }
  0x2a   :  { %292 = vmatprep.subr.bf16.mxu0 %v388_v0  ;;  %286 = vmatprep.subr.bf16.mxu1 %v388_v0  ;;  %vm236_vm3 = vcmp.ge.s32.totalorder %v235_v25, 8  ;;  %vm237_vm4 = vcmp.lt.s32.totalorder %v235_v25, 16  ;;  %s356_s17 = scalar_lea.vmem %s250_s16, 128  ;;  %p361_p3 = scmp.lt.s32.totalorder %s250_s16, %s250_s16 }
  0x2b   :  { %vm238_vm5 = vmand %vm236_vm3, %vm237_vm4  ;;  %p357_p2 = scmp.ne.s32.totalorder %s250_s16, %s356_s17  ;;  %p362_p4 = scmp.lt.s32.totalorder %s356_s17, %s356_s17 }
  0x2c   :  { %281 = vmatmul.mubr.msk.bf16.vlgmr.msra.gmra.mrb[0].mxu0 %vm67_vm1, %v56_v3 }
  0x2d   :  { %296 = vmatprep.mubr.msk.bf16.mxu0 %vm389_vm0, %v388_v0  ;;  %287 = vmatpush3.bf16.msra.mxu1 %v309_v5  ;;  %p363_p5 = por %p362_p4, %p361_p3 }
  0x2e   :  { %293 = vmatpush3.bf16.msra.mxu0 %v310_v6 }
  0x2f   :  { %294 = vmatprep.subr.bf16.mxu0 %v388_v0  ;;  %p364_p6 = pnand %p363_p5, %p357_p2 }
  0x32   :  { %295 = vmatpush3.bf16.msra.mxu0 %v311_v15 }
  0xff   :  { %v105_v8 = vpop.f32.mrb[0].mxu0 }
 0x100   :  { %v106_v9 = vadd.f32 %v259_v7, %v105_v8  ;;  %v282_v10 = vpop.f32.mrb[1].mxu0 }
 0x101   :  { %v108_v11 = vpop.f32.mrb[2].mxu0 }
 0x102   :  { %v111_v12 = vmax.f32 %v106_v9, 0.0  ;;  %v283_v13 = vpop.f32.mrb[3].mxu0 }
 0x104   :  { %v112_v14 = vpack.c.bf16 %v111_v12, %v111_v12 }
 0x106   :  { %289 = vmatmul.mubr.msk.bf16.vlgmr.msra.gmra.mrb[0].mxu1 %vm129_vm2, %v112_v14 }
 0x1d9   :  { %v167_v17 = vpop.f32.mrb[0].mxu1 }
 0x1da   :  { %v168_v18 = vadd.f32 %v262_v16, %v167_v17  ;;  %v290_v19 = vpop.f32.mrb[1].mxu1 }
 0x1db   :  { %v170_v20 = vpop.f32.mrb[2].mxu1 }
 0x1dc   :  { %v173_v21 = vmax.f32 %v168_v18, 0.0  ;;  %v291_v22 = vpop.f32.mrb[3].mxu1 }
 0x1de   :  { %v174_v23 = vpack.c.bf16 %v173_v21, %v173_v21 }
 0x1e0   :  { %297 = vmatmul.mubr.msk.bf16.vlgmr.msra.gmra.mrb[4].mxu0 %vm129_vm2, %v174_v23 }
 0x2b3   :  { %v228_v27 = vpop.f32.mrb[4].mxu0 }
 0x2b4   :  { %v229_v28 = vadd.f32 %v266_v26, %v228_v27  ;;  %v298_v29 = vpop.f32.mrb[5].mxu0 }
 0x2b5   :  { %v231_v30 = vpop.f32.mrb[6].mxu0 }
 0x2b6   :  { %v239_v31 = vmax.f32 %v229_v28, -20.0  ;;  %v299_v32 = vpop.f32.mrb[7].mxu0 }
 0x2b8   :  { %v240_v33 = vmin.f32 %v239_v31, 2.0 }
 0x2ba   :  { %v241_v34 = vsel %vm238_vm5, %v240_v33, %v229_v28 }
 0x2bb   :  { %242 = vst [vmem:[#allocation7] sm:$0xff] %v241_v34 }
 0x2bc   :  { %367 = shalt.err (!%p364_p6)
}
 0x2bd   :  { %s368_s19 = scalar_lea.hbm %s466_s3, 128 }
 0x2be   :  { %p369_p7 = scmp.ne.s32.totalorder %s466_s3, %s368_s19  ;;  %p372_p8 = scmp.lt.u32.totalorder %s368_s19, %s466_s3 }
 0x2c0   :  { %p374_p9 = pnand %p372_p8, %p369_p7 }
 0x2c2   :  { %377 = shalt.err (!%p374_p9)
}
 0x2c3   :  { %252 = dma.vmem_to_hbm [thread:$0]  %s250_s16, 128, %s466_s3, [#allocation4]  }
 0x2c4   :  { %382 = dma.done.wait [#allocation4], 128  }
 0x2c5   :  { %383 = vsyncadd [#allocation4], 4294967168 }
 0x2c6   :  { %256 = vsyncpa [#allocation3], 1 }
 0x2c7   :  { %257 = vsyncpa [#allocation6], 1 }
 0x2c8   :  { %258 = vsyncpa [#allocation4], 1 }

</bundles_post_ra>
